<compile_context>
chip_gen: v5e
topology: v5e:2x2
jax: 0.10.0
libtpu: 0.0.40
codegen_flags: <defaults>
</compile_context>

<pallas_src>
import jax
import jax.numpy as jnp
from jax.experimental import pallas as pl
from jax.experimental.pallas import tpu as pltpu

IN, H1, H2, H3, OUT = 18, 64, 128, 64, 2
LANES = 128            # every layer is padded to 128 lanes (lane-dense)
_TILE_B = 256          # row tile for the large-batch gridded path


def _align8(n):
    return -(-n // 8) * 8


# Row offsets of each section inside the packed (rows, 128) parameter slab.
# Every section starts on an 8-row (sublane-tile) boundary.
_O_W1 = 0                          # (IN, 128)   cols >= 64 are zero
_O_B1 = _align8(_O_W1 + IN)        # 24          (1, 128)
_O_W2 = _align8(_O_B1 + 1)         # 32          (128, 128) rows >= 64 are zero
_O_B2 = _align8(_O_W2 + LANES)     # 160         (1, 128)
_O_W3 = _align8(_O_B2 + 1)         # 168         (128, 128) cols >= 64 are zero
_O_B3 = _align8(_O_W3 + LANES)     # 296         (1, 128)
_O_W4 = _align8(_O_B3 + 1)         # 304         (128, 128) rows >= 64, cols >= 2 zero
_O_B4 = _align8(_O_W4 + LANES)     # 432         (1, 128)
_P_ROWS = _align8(_O_B4 + 1)       # 440  -> slab is ~220 KiB f32, trivially VMEM-resident


# ----------------------------- Pallas kernel ---------------------------------
def _actor_mlp_kernel(x_ref, p_ref, o_ref):
    """x_ref: (tile_b, 18), p_ref: (440, 128) packed params, o_ref: (tile_b, 128)."""
    x = x_ref[...]

    w1 = p_ref[_O_W1:_O_W1 + IN, :]
    b1 = p_ref[_O_B1:_O_B1 + 1, :]
    w2 = p_ref[_O_W2:_O_W2 + LANES, :]
    b2 = p_ref[_O_B2:_O_B2 + 1, :]
    w3 = p_ref[_O_W3:_O_W3 + LANES, :]
    b3 = p_ref[_O_B3:_O_B3 + 1, :]
    w4 = p_ref[_O_W4:_O_W4 + LANES, :]
    b4 = p_ref[_O_B4:_O_B4 + 1, :]

    h = jnp.maximum(jnp.dot(x, w1, preferred_element_type=jnp.float32) + b1, 0.0)
    h = jnp.maximum(jnp.dot(h, w2, preferred_element_type=jnp.float32) + b2, 0.0)
    h = jnp.maximum(jnp.dot(h, w3, preferred_element_type=jnp.float32) + b3, 0.0)
    y = jnp.dot(h, w4, preferred_element_type=jnp.float32) + b4
    o_ref[...] = jnp.tanh(y).astype(o_ref.dtype)


# ------------------------------- wrapper --------------------------------------
def _cost(b):
    flops = 2 * b * (IN * LANES + 3 * LANES * LANES)
    bytes_accessed = b * IN * 4 + _P_ROWS * LANES * 4 + b * LANES * 4
    return pl.CostEstimate(flops=flops, transcendentals=b * LANES,
                           bytes_accessed=bytes_accessed)


def actor_forward(packed_params, state):
    """Fused forward pass of SimpleActorNetwork; framestack is intentionally unused."""
    telemetry = state['telemetry'].astype(jnp.float32)
    B = telemetry.shape[0]

    if B <= _TILE_B:
        # Small batch: single un-gridded launch, everything full-array in VMEM.
        out = pl.pallas_call(
            _actor_mlp_kernel,
            out_shape=jax.ShapeDtypeStruct((B, LANES), jnp.float32),
            in_specs=[pl.BlockSpec(memory_space=pltpu.MemorySpace.VMEM),
                      pl.BlockSpec(memory_space=pltpu.MemorySpace.VMEM)],
            out_specs=pl.BlockSpec(memory_space=pltpu.MemorySpace.VMEM),
            cost_estimate=_cost(B),
        )(telemetry, packed_params)
        return out[:, :OUT]

    # Large batch: row-tiled grid, weights stay VMEM-resident across all steps,
    # batch axis is "parallel" so v7x's two TensorCores split the tiles.
    n_tiles = pl.cdiv(B, _TILE_B)
    Bp = n_tiles * _TILE_B
    x = jnp.zeros((Bp, IN), jnp.float32).at[:B].set(telemetry)
    out = pl.pallas_call(
        _actor_mlp_kernel,
        out_shape=jax.ShapeDtypeStruct((Bp, LANES), jnp.float32),
        grid=(n_tiles,),
        in_specs=[pl.BlockSpec((_TILE_B, IN), lambda i: (i, 0)),
                  pl.BlockSpec((_P_ROWS, LANES), lambda i: (0, 0))],
        out_specs=pl.BlockSpec((_TILE_B, LANES), lambda i: (i, 0)),
        compiler_params=pltpu.CompilerParams(dimension_semantics=("parallel",)),
        cost_estimate=_cost(Bp),
    )(x, packed_params)
    return out[:B, :OUT]


# --------------------------- parameter construction ---------------------------
def init_params(key):
    """PyTorch nn.Linear default init; weights stored (n_in, n_out) so x @ W applies."""
    keys = jax.random.split(key, 8)

    def linear_params(kw, kb, n_in, n_out):
        bound = 1.0 / (n_in ** 0.5)
        w = jax.random.uniform(kw, (n_in, n_out), minval=-bound, maxval=bound,
                               dtype=jnp.float32)
        b = jax.random.uniform(kb, (n_out,), minval=-bound, maxval=bound,
                               dtype=jnp.float32)
        return dict(w=w, b=b)

    return {
        'fc1': linear_params(keys[0], keys[1], IN, H1),
        'fc2': linear_params(keys[2], keys[3], H1, H2),
        'fc3': linear_params(keys[4], keys[5], H2, H3),
        'fc4': linear_params(keys[6], keys[7], H3, OUT),
    }


def pack_params(params):
    """Pack all weights/biases into one zero-padded, lane-dense (440, 128) f32 slab."""
    p = jnp.zeros((_P_ROWS, LANES), jnp.float32)
    p = p.at[_O_W1:_O_W1 + IN, :H1].set(params['fc1']['w'])
    p = p.at[_O_B1, :H1].set(params['fc1']['b'])
    p = p.at[_O_W2:_O_W2 + H1, :H2].set(params['fc2']['w'])
    p = p.at[_O_B2, :H2].set(params['fc2']['b'])
    p = p.at[_O_W3:_O_W3 + H2, :H3].set(params['fc3']['w'])
    p = p.at[_O_B3, :H3].set(params['fc3']['b'])
    p = p.at[_O_W4:_O_W4 + H3, :OUT].set(params['fc4']['w'])
    p = p.at[_O_B4, :OUT].set(params['fc4']['b'])
    return p


# -------------------------------- main -----------------------------------------
if __name__ == "__main__":
    key = jax.random.PRNGKey(0)
    pkey, fkey, tkey = jax.random.split(key, 3)
    packed = pack_params(init_params(pkey))

    # state dict mirrors the PyTorch forward signature; framestack is unused.
    state = {
        'framestack': jax.random.normal(fkey, (2, 4, 3, 16, 16), dtype=jnp.float32),
        'telemetry': jax.random.normal(tkey, (2, 18), dtype=jnp.float32),
    }

    out = actor_forward(packed, state)
    out = jax.block_until_ready(out)
    assert out.shape == (2, 2) and out.dtype == jnp.float32
    # Tanh output must lie in [-1, 1].
    assert bool(jnp.all(jnp.abs(out) <= 1.0))
    print("KERNEL_OK")
</pallas_src>

<mosaic_0001>
module attributes {stable_mosaic.version = 11 : i64} {
  func.func @_actor_mlp_kernel(%arg0: memref<2x18xf32, #tpu.memory_space<vmem>>, %arg1: memref<440x128xf32, #tpu.memory_space<vmem>>, %arg2: memref<2x128xf32, #tpu.memory_space<vmem>>) attributes {dimension_semantics = [], scalar_prefetch = 0 : i64, scratch_operands = 0 : i64, tpu.core_type = #tpu.core_type<tc>} {
    %c0 = arith.constant 0 : index
    %c0_0 = arith.constant 0 : index
    %0 = vector.load %arg0[%c0, %c0_0] : memref<2x18xf32, #tpu.memory_space<vmem>>, vector<2x18xf32>
    %c0_1 = arith.constant 0 : index
    %c0_2 = arith.constant 0 : index
    %1 = vector.load %arg1[%c0_1, %c0_2] : memref<440x128xf32, #tpu.memory_space<vmem>>, vector<18x128xf32>
    %c24 = arith.constant 24 : index
    %c0_3 = arith.constant 0 : index
    %2 = vector.load %arg1[%c24, %c0_3] : memref<440x128xf32, #tpu.memory_space<vmem>>, vector<1x128xf32>
    %c32 = arith.constant 32 : index
    %c0_4 = arith.constant 0 : index
    %3 = vector.load %arg1[%c32, %c0_4] : memref<440x128xf32, #tpu.memory_space<vmem>>, vector<128x128xf32>
    %c160 = arith.constant 160 : index
    %c0_5 = arith.constant 0 : index
    %4 = vector.load %arg1[%c160, %c0_5] : memref<440x128xf32, #tpu.memory_space<vmem>>, vector<1x128xf32>
    %c168 = arith.constant 168 : index
    %c0_6 = arith.constant 0 : index
    %5 = vector.load %arg1[%c168, %c0_6] : memref<440x128xf32, #tpu.memory_space<vmem>>, vector<128x128xf32>
    %c296 = arith.constant 296 : index
    %c0_7 = arith.constant 0 : index
    %6 = vector.load %arg1[%c296, %c0_7] : memref<440x128xf32, #tpu.memory_space<vmem>>, vector<1x128xf32>
    %c304 = arith.constant 304 : index
    %c0_8 = arith.constant 0 : index
    %7 = vector.load %arg1[%c304, %c0_8] : memref<440x128xf32, #tpu.memory_space<vmem>>, vector<128x128xf32>
    %c432 = arith.constant 432 : index
    %c0_9 = arith.constant 0 : index
    %8 = vector.load %arg1[%c432, %c0_9] : memref<440x128xf32, #tpu.memory_space<vmem>>, vector<1x128xf32>
    %cst = arith.constant dense<0.000000e+00> : vector<2x128xf32>
    %9 = tpu.matmul %0, %1, %cst {dimension_numbers = #tpu.dot_dimension_numbers<[1], [0], [0], [1], [0, 0, 1, 1], [], []>} : vector<2x18xf32>, vector<18x128xf32>, vector<2x128xf32> -> vector<2x128xf32>
    %10 = vector.broadcast %2 : vector<1x128xf32> to vector<2x128xf32>
    %11 = arith.addf %9, %10 : vector<2x128xf32>
    %cst_10 = arith.constant 0.000000e+00 : f32
    %12 = vector.broadcast %cst_10 : f32 to vector<2x128xf32>
    %13 = arith.maximumf %11, %12 : vector<2x128xf32>
    %cst_11 = arith.constant dense<0.000000e+00> : vector<2x128xf32>
    %14 = tpu.matmul %13, %3, %cst_11 {dimension_numbers = #tpu.dot_dimension_numbers<[1], [0], [0], [1], [0, 0, 1, 1], [], []>} : vector<2x128xf32>, vector<128x128xf32>, vector<2x128xf32> -> vector<2x128xf32>
    %15 = vector.broadcast %4 : vector<1x128xf32> to vector<2x128xf32>
    %16 = arith.addf %14, %15 : vector<2x128xf32>
    %cst_12 = arith.constant 0.000000e+00 : f32
    %17 = vector.broadcast %cst_12 : f32 to vector<2x128xf32>
    %18 = arith.maximumf %16, %17 : vector<2x128xf32>
    %cst_13 = arith.constant dense<0.000000e+00> : vector<2x128xf32>
    %19 = tpu.matmul %18, %5, %cst_13 {dimension_numbers = #tpu.dot_dimension_numbers<[1], [0], [0], [1], [0, 0, 1, 1], [], []>} : vector<2x128xf32>, vector<128x128xf32>, vector<2x128xf32> -> vector<2x128xf32>
    %20 = vector.broadcast %6 : vector<1x128xf32> to vector<2x128xf32>
    %21 = arith.addf %19, %20 : vector<2x128xf32>
    %cst_14 = arith.constant 0.000000e+00 : f32
    %22 = vector.broadcast %cst_14 : f32 to vector<2x128xf32>
    %23 = arith.maximumf %21, %22 : vector<2x128xf32>
    %cst_15 = arith.constant dense<0.000000e+00> : vector<2x128xf32>
    %24 = tpu.matmul %23, %7, %cst_15 {dimension_numbers = #tpu.dot_dimension_numbers<[1], [0], [0], [1], [0, 0, 1, 1], [], []>} : vector<2x128xf32>, vector<128x128xf32>, vector<2x128xf32> -> vector<2x128xf32>
    %25 = vector.broadcast %8 : vector<1x128xf32> to vector<2x128xf32>
    %26 = arith.addf %24, %25 : vector<2x128xf32>
    %27 = math.tanh %26 : vector<2x128xf32>
    %c0_16 = arith.constant 0 : index
    %c0_17 = arith.constant 0 : index
    %28 = vector.load %arg2[%c0_16, %c0_17] : memref<2x128xf32, #tpu.memory_space<vmem>>, vector<2x128xf32>
    tpu.vector_store %arg2[%c0_16, %c0_17], %27 {strides = array<i32>} : memref<2x128xf32, #tpu.memory_space<vmem>>, vector<2x128xf32>,
    return
  }
}

</mosaic_0001>

<bundles_post_ra>
// kernel: tpu_custom_call.1
= control target key start
LH: loop header
LB: loop body
LE: loop exit
PB: predicated region body
PF: predicated region fallthrough
CT: control target
= control target key end

     0   :  { %7 = vsyncpa [#allocation3], 0  ;;  %s333_s0 = inlined_call_operand.hbm [shape: f32[2,18], index: 0, kind: input, shape index: {}]   ;;  %s334_s1 = inlined_call_operand.hbm [shape: f32[440,128], index: 1, kind: input, shape index: {}]   ;;  %s335_s2 = inlined_call_operand.hbm [shape: f32[2,128], index: 2, kind: output, shape index: {}]  }
   0x1   :  { %8 = vsyncpa [#allocation6], 0 }
   0x2   :  { %9 = vsyncpa [#allocation4], 0  ;;  %s15_s11 = sshll.u32 %s333_s0, 4  ;;  %s304_s12 = smov [#allocation2]   ;;  %s16_s11 = int_to_ptr.hbm [resolvable:$true] %s15_s11 }
   0x3   :  { %s17_s13 = sshll.u32 %s304_s12, 4  ;;  %s25_s16 = sshll.u32 %s334_s1, 4  ;;  %s18_s13 = int_to_ptr.vmem [resolvable:$true] %s17_s13  ;;  %s26_s16 = int_to_ptr.hbm [resolvable:$true] %s25_s16 }
   0x4   :  { %20 = dma.hbm_to_vmem [thread:$0]  %s16_s11, 32, %s18_s13, [#allocation3]  }
   0x5   :  { %s305_s17 = smov [#allocation5]   ;;  %s306_s19 = smov 128  }
   0x6   :  { %s27_s18 = sshll.u32 %s305_s17, 4  ;;  %s307_s20 = smov 8   ;;  %s28_s18 = int_to_ptr.vmem [resolvable:$true] %s27_s18 }
   0x7   :  { %33 = dma.hbm_to_vmem [thread:$0]  %s26_s16, 7040, %s28_s18, [#allocation6], %s306_s19, %s306_s19, %s307_s20  }
   0x8   :  { %298 = dma.done.wait [#allocation3], 32  }
   0x9   :  { %299 = vsyncadd [#allocation3], 4294967264 }
   0xa   :  { %300 = dma.done.wait [#allocation6], 7040  }
   0xb   :  { %301 = vsyncadd [#allocation6], 4294960256  ;;  %vm103_vm0 = vcmask 1041408   ;;  %v45_v0 = vld [vmem:[#allocation5 + $0x10] sm:$0x3]  ;;  %v44_v1 = vld [vmem:[#allocation5 + $0x8] sm:$0xff] }
   0xc   :  { %213 = vmatpush.msk.msra.mxu0 %vm103_vm0, %v45_v0  ;;  %v62_v2 = vld [vmem:[#allocation5 + $0x98] sm:$0xff]  ;;  %v61_v3 = vld [vmem:[#allocation5 + $0x90] sm:$0xff]  ;;  %v43_v4 = vld [vmem:[#allocation5] sm:$0xff]  ;;  %vm99_vm1 = vcmask 146432   ;;  %s308_s0 = smov [#allocation7]   ;;  %s202_s23 = sshll.u32 %s335_s2, 4  ;;  %s203_s23 = int_to_ptr.hbm [resolvable:$true] %s202_s23 }
   0xd   :  { %129 = vmatpush.msra.mxu1 %v62_v2  ;;  %v42_v5 = vld [vmem:[#allocation2] sm:$0x3]  ;;  %v60_v6 = vld [vmem:[#allocation5 + $0x88] sm:$0xff]  ;;  %v59_v7 = vld [vmem:[#allocation5 + $0x80] sm:$0xff]  ;;  %s200_s1 = sshll.u32 %s308_s0, 4  ;;  %s201_s1 = int_to_ptr.vmem [resolvable:$true] %s200_s1 }
   0xe   :  { %121 = vmatpush.msra.mxu0 %v44_v1  ;;  %v58_v8 = vld [vmem:[#allocation5 + $0x78] sm:$0xff]  ;;  %v57_v9 = vld [vmem:[#allocation5 + $0x70] sm:$0xff]  ;;  %v56_v10 = vld [vmem:[#allocation5 + $0x68] sm:$0xff] }
   0xf   :  { %130 = vmatpush.msra.mxu1 %v61_v3  ;;  %v55_v11 = vld [vmem:[#allocation5 + $0x60] sm:$0xff]  ;;  %v54_v12 = vld [vmem:[#allocation5 + $0x58] sm:$0xff]  ;;  %v53_v13 = vld [vmem:[#allocation5 + $0x50] sm:$0xff] }
  0x10   :  { %122 = vmatpush.msra.mxu0 %v43_v4  ;;  %v52_v14 = vld [vmem:[#allocation5 + $0x48] sm:$0xff]  ;;  %v51_v15 = vld [vmem:[#allocation5 + $0x40] sm:$0xff]  ;;  %v50_v16 = vld [vmem:[#allocation5 + $0x38] sm:$0xff] }
  0x11   :  { %214 = vmatmul.msk.f32.vlgmr.msra.gmra.mxu0 %vm99_vm1, %v42_v5  ;;  %131 = vmatpush.msra.mxu1 %v60_v6  ;;  %v49_v17 = vld [vmem:[#allocation5 + $0x30] sm:$0xff]  ;;  %v48_v18 = vld [vmem:[#allocation5 + $0x28] sm:$0xff]  ;;  %v47_v19 = vld [vmem:[#allocation5 + $0x20] sm:$0xff] }
  0x12   :  { %v79_v20 = vld [vmem:[#allocation5 + $0x120] sm:$0xff]  ;;  %v78_v21 = vld [vmem:[#allocation5 + $0x118] sm:$0xff]  ;;  %v77_v22 = vld [vmem:[#allocation5 + $0x110] sm:$0xff] }
  0x13   :  { %132 = vmatpush.msra.mxu1 %v59_v7  ;;  %151 = vmatpush.msra.mxu2 %v79_v20  ;;  %v76_v23 = vld [vmem:[#allocation5 + $0x108] sm:$0xff]  ;;  %v75_v24 = vld [vmem:[#allocation5 + $0x100] sm:$0xff]  ;;  %v74_v25 = vld [vmem:[#allocation5 + $0xf8] sm:$0xff] }
  0x14   :  { %v73_v26 = vld [vmem:[#allocation5 + $0xf0] sm:$0xff]  ;;  %v72_v27 = vld [vmem:[#allocation5 + $0xe8] sm:$0xff]  ;;  %v71_v28 = vld [vmem:[#allocation5 + $0xe0] sm:$0xff] }
  0x15   :  { %133 = vmatpush.msra.mxu1 %v58_v8  ;;  %152 = vmatpush.msra.mxu2 %v78_v21  ;;  %v70_v29 = vld [vmem:[#allocation5 + $0xd8] sm:$0xff]  ;;  %v69_v30 = vld [vmem:[#allocation5 + $0xd0] sm:$0xff]  ;;  %v68_v31 = vld [vmem:[#allocation5 + $0xc8] sm:$0xff] }
  0x16   :  { %v67_v32 = vld [vmem:[#allocation5 + $0xc0] sm:$0xff]  ;;  %v220_v33 = vld [vmem:[#allocation5 + $0x18] ss:$0 sm:$0xff]  ;;  %v65_v38 = vld [vmem:[#allocation5 + $0xb0] sm:$0xff] }
  0x17   :  { %134 = vmatpush.msra.mxu1 %v57_v9  ;;  %153 = vmatpush.msra.mxu2 %v77_v22  ;;  %v66_v37 = vld [vmem:[#allocation5 + $0xb8] sm:$0xff]  ;;  %v64_v39 = vld [vmem:[#allocation5 + $0xa8] sm:$0xff]  ;;  %v95_v41 = vld [vmem:[#allocation5 + $0x1a0] sm:$0xff] }
  0x18   :  { %v96_v40 = vld [vmem:[#allocation5 + $0x1a8] sm:$0xff]  ;;  %v94_v42 = vld [vmem:[#allocation5 + $0x198] sm:$0xff]  ;;  %v93_v43 = vld [vmem:[#allocation5 + $0x190] sm:$0xff] }
  0x19   :  { %135 = vmatpush.msra.mxu1 %v56_v10  ;;  %154 = vmatpush.msra.mxu2 %v76_v23  ;;  %v92_v44 = vld [vmem:[#allocation5 + $0x188] sm:$0xff]  ;;  %v91_v45 = vld [vmem:[#allocation5 + $0x180] sm:$0xff]  ;;  %v90_v46 = vld [vmem:[#allocation5 + $0x178] sm:$0xff] }
  0x1a   :  { %173 = vmatpush.msra.mxu3 %v96_v40  ;;  %v89_v47 = vld [vmem:[#allocation5 + $0x170] sm:$0xff]  ;;  %v88_v48 = vld [vmem:[#allocation5 + $0x168] sm:$0xff]  ;;  %v87_v49 = vld [vmem:[#allocation5 + $0x160] sm:$0xff] }
  0x1b   :  { %136 = vmatpush.msra.mxu1 %v55_v11  ;;  %155 = vmatpush.msra.mxu2 %v75_v24  ;;  %v86_v50 = vld [vmem:[#allocation5 + $0x158] sm:$0xff]  ;;  %v85_v51 = vld [vmem:[#allocation5 + $0x150] sm:$0xff]  ;;  %v84_v52 = vld [vmem:[#allocation5 + $0x148] sm:$0xff] }
  0x1c   :  { %174 = vmatpush.msra.mxu3 %v95_v41  ;;  %v221_v53 = vld [vmem:[#allocation5 + $0xa0] ss:$0 sm:$0xff]  ;;  %v82_v58 = vld [vmem:[#allocation5 + $0x138] sm:$0xff]  ;;  %v81_v59 = vld [vmem:[#allocation5 + $0x130] sm:$0xff] }
  0x1d   :  { %137 = vmatpush.msra.mxu1 %v54_v12  ;;  %156 = vmatpush.msra.mxu2 %v74_v25  ;;  %v83_v57 = vld [vmem:[#allocation5 + $0x140] sm:$0xff]  ;;  %v222_v60 = vld [vmem:[#allocation5 + $0x128] ss:$0 sm:$0xff]  ;;  %v223_v0 = vld [vmem:[#allocation5 + $0x1b0] ss:$0 sm:$0xff] }
  0x1e   :  { %175 = vmatpush.msra.mxu3 %v94_v42 }
  0x1f   :  { %138 = vmatpush.msra.mxu1 %v53_v13  ;;  %157 = vmatpush.msra.mxu2 %v73_v26 }
  0x20   :  { %176 = vmatpush.msra.mxu3 %v93_v43 }
  0x21   :  { %139 = vmatpush.msra.mxu1 %v52_v14  ;;  %158 = vmatpush.msra.mxu2 %v72_v27 }
  0x22   :  { %177 = vmatpush.msra.mxu3 %v92_v44 }
  0x23   :  { %140 = vmatpush.msra.mxu1 %v51_v15  ;;  %159 = vmatpush.msra.mxu2 %v71_v28 }
  0x24   :  { %178 = vmatpush.msra.mxu3 %v91_v45 }
  0x25   :  { %141 = vmatpush.msra.mxu1 %v50_v16  ;;  %160 = vmatpush.msra.mxu2 %v70_v29 }
  0x26   :  { %179 = vmatpush.msra.mxu3 %v90_v46 }
  0x27   :  { %142 = vmatpush.msra.mxu1 %v49_v17  ;;  %161 = vmatpush.msra.mxu2 %v69_v30 }
  0x28   :  { %180 = vmatpush.msra.mxu3 %v89_v47 }
  0x29   :  { %143 = vmatpush.msra.mxu1 %v48_v18  ;;  %162 = vmatpush.msra.mxu2 %v68_v31 }
  0x2a   :  { %181 = vmatpush.msra.mxu3 %v88_v48 }
  0x2b   :  { %144 = vmatpush.msra.mxu1 %v47_v19  ;;  %163 = vmatpush.msra.mxu2 %v67_v32 }
  0x2c   :  { %182 = vmatpush.msra.mxu3 %v87_v49 }
  0x2d   :  { %164 = vmatpush.msra.mxu2 %v66_v37 }
  0x2e   :  { %183 = vmatpush.msra.mxu3 %v86_v50 }
  0x2f   :  { %165 = vmatpush.msra.mxu2 %v65_v38 }
  0x30   :  { %184 = vmatpush.msra.mxu3 %v85_v51 }
  0x31   :  { %166 = vmatpush.msra.mxu2 %v64_v39 }
  0x32   :  { %185 = vmatpush.msra.mxu3 %v84_v52 }
  0x34   :  { %186 = vmatpush.msra.mxu3 %v83_v57 }
  0x36   :  { %187 = vmatpush.msra.mxu3 %v82_v58 }
  0x38   :  { %188 = vmatpush.msra.mxu3 %v81_v59 }
  0x8e   :  { %v124_v34 = vpop.f32.mrf.mxu0 }
  0x8f   :  { %v125_v35 = vadd.f32 %v220_v33, %v124_v34 }
  0x91   :  { %v127_v36 = vmax.f32 %v125_v35, 0.0 }
  0x93   :  { %145 = vmatmul.f32.vlgmr.msra.gmra.mxu1 %v127_v36 }
 0x110   :  { %v146_v54 = vpop.f32.mrf.mxu1 }
 0x111   :  { %v147_v55 = vadd.f32 %v221_v53, %v146_v54 }
 0x113   :  { %v149_v56 = vmax.f32 %v147_v55, 0.0 }
 0x115   :  { %167 = vmatmul.f32.vlgmr.msra.gmra.mxu2 %v149_v56 }
 0x198   :  { %v168_v61 = vpop.f32.mrf.mxu2 }
 0x199   :  { %v169_v62 = vadd.f32 %v222_v60, %v168_v61 }
 0x19b   :  { %v171_v63 = vmax.f32 %v169_v62, 0.0 }
 0x19d   :  { %189 = vmatmul.f32.vlgmr.msra.gmra.mxu3 %v171_v63 }
 0x220   :  { %v190_v1 = vpop.f32.mrf.mxu3 }
 0x221   :  { %v191_v2 = vadd.f32 %v223_v0, %v190_v1 }
 0x223   :  { %224 = vtanh.f32 %v191_v2 }
 0x229   :  { %v225_v3 = vpop.eup %224 }
 0x22a   :  { %194 = vst [vmem:[#allocation7] sm:$0x3] %v225_v3 }
 0x22b   :  { %205 = dma.vmem_to_hbm [thread:$0]  %s201_s1, 32, %s203_s23, [#allocation4]  }
 0x22c   :  { %302 = dma.done.wait [#allocation4], 32  }
 0x22d   :  { %303 = vsyncadd [#allocation4], 4294967264 }
 0x22e   :  { %210 = vsyncpa [#allocation3], 1 }
 0x22f   :  { %211 = vsyncpa [#allocation6], 1 }
 0x230   :  { %212 = vsyncpa [#allocation4], 1 }

</bundles_post_ra>
